<compile_context>
chip_gen: v7x
topology: tpu7x:2x2x1
jax: 0.10.0
libtpu: 0.0.40
codegen_flags: <defaults>
</compile_context>

<pallas_src>
import functools

import jax
import jax.numpy as jnp
from jax import lax
from jax.experimental import pallas as pl
from jax.experimental.pallas import tpu as pltpu


# ----------------------------- Pallas kernel -----------------------------

def _rgcn_layer_kernel(mask_ref, ablk_r_ref, ablk_i_ref,
                       x_ref, a_ref, h_ref, inv_ref, root_ref, bias_ref,
                       out_ref, *, activation, valid_dout):
    """One RGCNConv layer.

    Grid: (num_dst_tiles ["parallel"], num_relations ["arbitrary", reduction]).
    Scalar-prefetched (SMEM) schedule, flattened in grid order (i major, r minor):
      mask_ref[t]                : this (relation, dst-tile) block has edges
      ablk_r_ref[t], ablk_i_ref[t]: A block index to fetch at step t (carried
                                    from the last nonzero block when empty, so
                                    the pipeline elides the DMA).
    """
    i = pl.program_id(0)            # dst tile
    r = pl.program_id(1)            # relation (reduction axis, trailing)
    nr = pl.num_programs(1)
    t = i * nr + r                  # flattened grid step

    # init: self-loop (root) transform + bias, accumulated directly in out_ref
    @pl.when(r == 0)
    def _():
        out_ref[...] = (
            jnp.dot(x_ref[...], root_ref[...],
                    preferred_element_type=jnp.float32)
            + bias_ref[...]
        )

    # message passing for relation r on this dst tile:
    #   out += (1/deg) * (A_count[r, tile, :] @ H[r])
    # skipped entirely (matmul AND the A DMA, via the carried index_map) when
    # the (relation, dst-tile) adjacency block has no edges.
    @pl.when(mask_ref[t] != 0)
    def _():
        # i8 -> f32 -> bf16 keeps the converts on well-trodden lowering paths;
        # counts are small integers so both converts are exact.
        a_tile = a_ref[0].astype(jnp.float32).astype(jnp.bfloat16)   # (TM, N)
        msg = jnp.dot(a_tile, h_ref[r], preferred_element_type=jnp.float32)
        out_ref[...] += inv_ref[0] * msg        # exact f32 mean normalization

    # finalize: fused activation on the resident f32 out block
    @pl.when(r == nr - 1)
    def _():
        res = out_ref[...]
        if activation == "relu":
            res = jnp.maximum(res, 0.0)
        elif activation == "log_softmax":
            if valid_dout < res.shape[1]:       # mask padded lanes out of softmax
                col = jax.lax.broadcasted_iota(jnp.int32, res.shape, 1)
                res = jnp.where(col < valid_dout, res, -jnp.inf)
            m = jnp.max(res, axis=1, keepdims=True)
            lse = jnp.log(jnp.sum(jnp.exp(res - m), axis=1, keepdims=True)) + m
            res = res - lse
        out_ref[...] = res


# ----------------------------- tiling helpers -----------------------------

def _round_up(x, m):
    return ((x + m - 1) // m) * m


def _vmem_capacity():
    try:
        return int(pltpu.get_tpu_info().vmem_capacity_bytes)
    except Exception:
        return 64 * 1024 * 1024     # conservative (v7x-sized) fallback


def _pick_tile_m(n, num_rel, din, dout_p, a_itemsize):
    """Largest dst tile that divides N and fits this generation's VMEM budget.

    Prefers 32-row alignment (int8 A packing) and >= 2 dst tiles so the
    'parallel' axis load-balances across v7x's two TensorCores.
    """
    budget = int(0.35 * _vmem_capacity())   # headroom for buffers + scratch
    resident = (2 * num_rel * n * dout_p * 2        # resident H (bf16)
                + 2 * din * dout_p * 2)             # root (bf16)

    def fits(tm):
        need = (resident
                + 2 * tm * n * a_itemsize           # A tile, double buffered
                + 2 * tm * din * 2                  # x tile (bf16)
                + 2 * tm * dout_p * 4               # out block (f32)
                + 2 * 8 * dout_p * 4)               # bias / inv_deg slack
        return need <= budget

    cap_tm = min(n, 1024)
    if n >= 64:
        cap_tm = min(cap_tm, n // 2)                # >= 2 tiles for megacore
    for step in (32, 8):                            # prefer int8 tile alignment
        tm = (cap_tm // step) * step
        while tm >= step:
            if n % tm == 0 and fits(tm):
                return tm
            tm -= step
    return n


# ----------------------------- layer wrapper -----------------------------

def rgcn_layer(x, adj_cnt, inv_deg, basis, comp, root, bias, activation,
               tile_m=None):
    """Basis recomposition + hoisted feature transform (JAX) + pallas_call."""
    N, Din = x.shape
    R = adj_cnt.shape[0]
    Dout = root.shape[1]
    Dout_p = _round_up(Dout, 128)

    TM = tile_m if tile_m is not None else _pick_tile_m(
        N, R, Din, Dout_p, adj_cnt.dtype.itemsize)
    assert N % TM == 0 and (TM % 8 == 0 or TM == N), "bad dst tile size"
    num_tiles = N // TM

    # ---- hoisted basis recomposition + per-relation transform (one matmul) ----
    W = jnp.einsum("rb,bio->rio", comp, basis)                      # (R, Din, Dout)
    W_cat = jnp.transpose(W, (1, 0, 2)).reshape(Din, R * Dout)
    H = (x @ W_cat).reshape(N, R, Dout)
    H = jnp.transpose(H, (1, 0, 2))                                 # (R, N, Dout)
    H = jnp.pad(H, ((0, 0), (0, 0), (0, Dout_p - Dout))).astype(jnp.bfloat16)

    x_b = x.astype(jnp.bfloat16)
    root_p = jnp.pad(root, ((0, 0), (0, Dout_p - Dout))).astype(jnp.bfloat16)
    bias_p = jnp.pad(bias.reshape(1, Dout),
                     ((0, 0), (0, Dout_p - Dout))).astype(jnp.float32)
    inv3 = inv_deg.reshape(R, N, 1).astype(jnp.float32)

    # ---- block-sparsity schedule (scalar-prefetched into SMEM) ----
    row_nz = jnp.any(adj_cnt != 0, axis=2)                          # (R, N)
    tile_mask = jnp.any(row_nz.reshape(R, num_tiles, TM), axis=2)   # (R, num_tiles)
    mask_flat = tile_mask.T.reshape(-1).astype(jnp.int32)           # i major, r minor
    r_flat = jnp.tile(jnp.arange(R, dtype=jnp.int32), num_tiles)
    i_flat = jnp.repeat(jnp.arange(num_tiles, dtype=jnp.int32), R)

    def _carry(carry, inp):
        m, rr, ii = inp
        new = jnp.where(m != 0, jnp.stack([rr, ii]), carry)
        return new, new

    _, carries = lax.scan(_carry, jnp.zeros((2,), jnp.int32),
                          (mask_flat, r_flat, i_flat))
    ablk_r = carries[:, 0]
    ablk_i = carries[:, 1]

    # ---- generation-aware VMEM limit ----
    vmem_cap = _vmem_capacity()
    vmem_need = (2 * TM * N * adj_cnt.dtype.itemsize   # A tile (double buffered)
                 + 2 * R * N * Dout_p * 2              # resident H
                 + 2 * TM * Din * 2                    # x tile (bf16)
                 + 2 * Din * Dout_p * 2                # root
                 + 2 * TM * Dout_p * 4                 # out block
                 + 2 * 8 * Dout_p * 4)                 # bias / inv_deg slack
    vmem_limit = int(min(max(2 * vmem_need, 32 * 1024 * 1024),
                         int(0.75 * vmem_cap)))

    kernel = functools.partial(_rgcn_layer_kernel, activation=activation,
                               valid_dout=Dout)

    out_p = pl.pallas_call(
        kernel,
        out_shape=jax.ShapeDtypeStruct((N, Dout_p), jnp.float32),
        grid_spec=pltpu.PrefetchScalarGridSpec(
            num_scalar_prefetch=3,                     # mask, carried A block (r, i)
            grid=(num_tiles, R),                       # reduction (relation) axis last
            in_specs=[
                pl.BlockSpec((TM, Din), lambda i, r, m, ar, ai: (i, 0)),       # x (bf16)
                pl.BlockSpec((1, TM, N),
                             lambda i, r, m, ar, ai:
                             (ar[i * R + r], ai[i * R + r], 0)),               # A (int8)
                pl.BlockSpec((R, N, Dout_p),
                             lambda i, r, m, ar, ai: (0, 0, 0)),               # H resident
                pl.BlockSpec((1, TM, 1), lambda i, r, m, ar, ai: (r, i, 0)),   # 1/deg
                pl.BlockSpec((Din, Dout_p), lambda i, r, m, ar, ai: (0, 0)),   # root
                pl.BlockSpec((1, Dout_p), lambda i, r, m, ar, ai: (0, 0)),     # bias
            ],
            out_specs=pl.BlockSpec((TM, Dout_p),
                                   lambda i, r, m, ar, ai: (i, 0)),
        ),
        compiler_params=pltpu.CompilerParams(
            dimension_semantics=("parallel", "arbitrary"),
            vmem_limit_bytes=vmem_limit),
    )(mask_flat, ablk_r, ablk_i, x_b, adj_cnt, H, inv3, root_p, bias_p)

    return out_p[:, :Dout]


# ----------------------------- model glue -----------------------------

def build_adjacency(edge_index, edge_type, num_nodes, num_relations):
    """Per-relation 8-bit edge-count matrix A[r, dst, src] + exact f32 1/deg."""
    src, dst = edge_index[0], edge_index[1]
    counts = jnp.zeros((num_relations, num_nodes, num_nodes), jnp.float32)
    counts = counts.at[edge_type, dst, src].add(1.0)
    deg = jnp.sum(counts, axis=2)                        # (R, N) per-(rel, dst) degree
    inv_deg = jnp.where(deg > 0, 1.0 / jnp.maximum(deg, 1.0), 0.0)
    adj_cnt = counts.astype(jnp.int8)                    # exact small integer counts
    return adj_cnt, inv_deg


def init_rgcn_params(key, num_nodes, num_relations, hidden_dim, num_classes,
                     num_bases=30):
    dims = [(num_nodes, hidden_dim),
            (hidden_dim, hidden_dim),
            (hidden_dim, num_classes)]
    params = []
    for din, dout in dims:
        key, k1, k2, k3 = jax.random.split(key, 4)
        scale = 1.0 / jnp.sqrt(jnp.float32(din))
        params.append(dict(
            basis=jax.random.normal(k1, (num_bases, din, dout), jnp.float32) * scale,
            comp=jax.random.normal(k2, (num_relations, num_bases), jnp.float32)
                 * (1.0 / num_bases),
            root=jax.random.normal(k3, (din, dout), jnp.float32) * scale,
            bias=jnp.zeros((dout,), jnp.float32),
        ))
    return params


def rgcn_forward(params, x, adj_cnt, inv_deg, tile_m=None):
    h = rgcn_layer(x, adj_cnt, inv_deg, activation="relu", tile_m=tile_m,
                   **params[0])
    h = rgcn_layer(h, adj_cnt, inv_deg, activation="relu", tile_m=tile_m,
                   **params[1])
    return rgcn_layer(h, adj_cnt, inv_deg, activation="log_softmax",
                      tile_m=tile_m, **params[2])


# ----------------------------- pure-JAX reference -----------------------------

def _layer_ref(x, adj_cnt, inv_deg, basis, comp, root, bias, activation):
    W = jnp.einsum("rb,bio->rio", comp, basis)
    H = jnp.einsum("ui,rio->ruo", x, W)                  # per-relation transformed feats
    # mirror the kernel's bf16 input streams (both paths accumulate in f32)
    H = H.astype(jnp.bfloat16).astype(jnp.float32)
    xb = x.astype(jnp.bfloat16).astype(jnp.float32)
    rb = root.astype(jnp.bfloat16).astype(jnp.float32)
    msg = jnp.einsum("rvu,ruo->rvo", adj_cnt.astype(jnp.float32), H)
    out = xb @ rb + bias + jnp.sum(inv_deg[:, :, None] * msg, axis=0)
    if activation == "relu":
        out = jnp.maximum(out, 0.0)
    elif activation == "log_softmax":
        out = jax.nn.log_softmax(out, axis=1)
    return out


def rgcn_forward_ref(params, x, adj_cnt, inv_deg):
    h = _layer_ref(x, adj_cnt, inv_deg, activation="relu", **params[0])
    h = _layer_ref(h, adj_cnt, inv_deg, activation="relu", **params[1])
    return _layer_ref(h, adj_cnt, inv_deg, activation="log_softmax", **params[2])


# ----------------------------- main -----------------------------

if __name__ == "__main__":
    # conv1 has in_channels == num_nodes, so node features are (N, num_nodes).
    num_nodes, num_relations, hidden_dim, num_classes = 64, 4, 32, 8
    num_edges = 256

    key = jax.random.PRNGKey(0)
    kx, ke, kt, kp = jax.random.split(key, 4)

    x = jax.random.normal(kx, (num_nodes, num_nodes), jnp.float32)
    edge_index = jax.random.randint(ke, (2, num_edges), 0, num_nodes)
    edge_type = jax.random.randint(kt, (num_edges,), 0, num_relations)

    adj_cnt, inv_deg = build_adjacency(edge_index, edge_type, num_nodes,
                                       num_relations)
    params = init_rgcn_params(kp, num_nodes, num_relations, hidden_dim,
                              num_classes, num_bases=30)

    # auto tile pick -> TM=32 here (2 dst tiles): exercises the multi-tile path,
    # the carried-index DMA skip, and 32-row int8 tile alignment.
    out = rgcn_forward(params, x, adj_cnt, inv_deg)
    out = jax.block_until_ready(out)

    ref = rgcn_forward_ref(params, x, adj_cnt, inv_deg)
    assert out.shape == (num_nodes, num_classes)
    assert jnp.allclose(out, ref, atol=2e-3, rtol=2e-3), "mismatch vs reference"

    print("KERNEL_OK")
</pallas_src>

<mosaic_0001>
module attributes {stable_mosaic.version = 11 : i64} {
  func.func @_rgcn_layer_kernel(%arg0: i32, %arg1: i32, %arg2: memref<8xi32, #tpu.memory_space<smem>>, %arg3: memref<8xi32, #tpu.memory_space<smem>>, %arg4: memref<8xi32, #tpu.memory_space<smem>>, %arg5: memref<32x64xbf16, #tpu.memory_space<vmem>>, %arg6: memref<1x32x64xi8, #tpu.memory_space<vmem>>, %arg7: memref<4x64x128xbf16, #tpu.memory_space<vmem>>, %arg8: memref<1x32x1xf32, #tpu.memory_space<vmem>>, %arg9: memref<64x128xbf16, #tpu.memory_space<vmem>>, %arg10: memref<1x128xf32, #tpu.memory_space<vmem>>, %arg11: memref<32x128xf32, #tpu.memory_space<vmem>>) attributes {dimension_semantics = [#tpu.dimension_semantics<parallel>, #tpu.dimension_semantics<arbitrary>], iteration_bounds = array<i64: 2, 4>, scalar_prefetch = 3 : i64, scratch_operands = 0 : i64, tpu.core_type = #tpu.core_type<tc>, window_params = [{transform_indices = @transform_0, window_bounds = array<i64: 32, 64>}, {transform_indices = @transform_1, window_bounds = array<i64: 1, 32, 64>}, {pipeline_mode = #tpu.pipeline_mode<synchronous>, transform_indices = @transform_2, window_bounds = array<i64: 4, 64, 128>}, {transform_indices = @transform_3, window_bounds = array<i64: 1, 32, 1>}, {pipeline_mode = #tpu.pipeline_mode<synchronous>, transform_indices = @transform_4, window_bounds = array<i64: 64, 128>}, {pipeline_mode = #tpu.pipeline_mode<synchronous>, transform_indices = @transform_5, window_bounds = array<i64: 1, 128>}, {transform_indices = @transform_6, window_bounds = array<i64: 32, 128>}]} {
    %c4_i32 = arith.constant 4 : i32
    %0 = arith.muli %arg0, %c4_i32 : i32
    %1 = arith.addi %0, %arg1 : i32
    %c0_i32 = arith.constant 0 : i32
    %2 = arith.cmpi eq, %arg1, %c0_i32 : i32
    %3 = arith.extui %2 : i1 to i32
    %c0_i32_0 = arith.constant 0 : i32
    %4 = arith.cmpi ne, %3, %c0_i32_0 : i32
    scf.if %4 {
      %c0 = arith.constant 0 : index
      %c0_4 = arith.constant 0 : index
      %13 = vector.load %arg5[%c0, %c0_4] : memref<32x64xbf16, #tpu.memory_space<vmem>>, vector<32x64xbf16>
      %c0_5 = arith.constant 0 : index
      %c0_6 = arith.constant 0 : index
      %14 = vector.load %arg9[%c0_5, %c0_6] : memref<64x128xbf16, #tpu.memory_space<vmem>>, vector<64x128xbf16>
      %cst = arith.constant dense<0.000000e+00> : vector<32x128xf32>
      %15 = tpu.matmul %13, %14, %cst {dimension_numbers = #tpu.dot_dimension_numbers<[1], [0], [0], [1], [0, 0, 1, 1], [], []>} : vector<32x64xbf16>, vector<64x128xbf16>, vector<32x128xf32> -> vector<32x128xf32>
      %c0_7 = arith.constant 0 : index
      %c0_8 = arith.constant 0 : index
      %16 = vector.load %arg10[%c0_7, %c0_8] : memref<1x128xf32, #tpu.memory_space<vmem>>, vector<1x128xf32>
      %17 = vector.broadcast %16 : vector<1x128xf32> to vector<32x128xf32>
      %18 = arith.addf %15, %17 : vector<32x128xf32>
      %c0_9 = arith.constant 0 : index
      %c0_10 = arith.constant 0 : index
      %19 = vector.load %arg11[%c0_9, %c0_10] : memref<32x128xf32, #tpu.memory_space<vmem>>, vector<32x128xf32>
      tpu.vector_store %arg11[%c0_9, %c0_10], %18 {strides = array<i32>} : memref<32x128xf32, #tpu.memory_space<vmem>>, vector<32x128xf32>,
    } else {
    }
    %5 = arith.index_cast %1 : i32 to index
    %6 = memref.load %arg2[%5] : memref<8xi32, #tpu.memory_space<smem>>
    %c0_i32_1 = arith.constant 0 : i32
    %7 = arith.cmpi ne, %6, %c0_i32_1 : i32
    %8 = arith.extui %7 : i1 to i32
    %c0_i32_2 = arith.constant 0 : i32
    %9 = arith.cmpi ne, %8, %c0_i32_2 : i32
    scf.if %9 {
      %c0 = arith.constant 0 : index
      %c0_4 = arith.constant 0 : index
      %c0_5 = arith.constant 0 : index
      %13 = vector.load %arg6[%c0, %c0_4, %c0_5] : memref<1x32x64xi8, #tpu.memory_space<vmem>>, vector<1x32x64xi8>
      %14 = vector.shape_cast %13 : vector<1x32x64xi8> to vector<32x64xi8>
      %15 = arith.sitofp %14 : vector<32x64xi8> to vector<32x64xf32>
      %16 = arith.truncf %15 : vector<32x64xf32> to vector<32x64xbf16>
      %17 = arith.index_cast %arg1 : i32 to index
      %c0_6 = arith.constant 0 : index
      %c0_7 = arith.constant 0 : index
      %18 = vector.load %arg7[%17, %c0_6, %c0_7] : memref<4x64x128xbf16, #tpu.memory_space<vmem>>, vector<1x64x128xbf16>
      %19 = vector.shape_cast %18 : vector<1x64x128xbf16> to vector<64x128xbf16>
      %cst = arith.constant dense<0.000000e+00> : vector<32x128xf32>
      %20 = tpu.matmul %16, %19, %cst {dimension_numbers = #tpu.dot_dimension_numbers<[1], [0], [0], [1], [0, 0, 1, 1], [], []>} : vector<32x64xbf16>, vector<64x128xbf16>, vector<32x128xf32> -> vector<32x128xf32>
      %c0_8 = arith.constant 0 : index
      %c0_9 = arith.constant 0 : index
      %21 = vector.load %arg11[%c0_8, %c0_9] : memref<32x128xf32, #tpu.memory_space<vmem>>, vector<32x128xf32>
      %c0_10 = arith.constant 0 : index
      %c0_11 = arith.constant 0 : index
      %c0_12 = arith.constant 0 : index
      %22 = vector.load %arg8[%c0_10, %c0_11, %c0_12] : memref<1x32x1xf32, #tpu.memory_space<vmem>>, vector<1x32x1xf32>
      %23 = vector.shape_cast %22 : vector<1x32x1xf32> to vector<32x1xf32>
      %24 = vector.broadcast %23 : vector<32x1xf32> to vector<32x128xf32>
      %25 = arith.mulf %24, %20 : vector<32x128xf32>
      %26 = arith.addf %21, %25 : vector<32x128xf32>
      %c0_13 = arith.constant 0 : index
      %c0_14 = arith.constant 0 : index
      %27 = vector.load %arg11[%c0_13, %c0_14] : memref<32x128xf32, #tpu.memory_space<vmem>>, vector<32x128xf32>
      tpu.vector_store %arg11[%c0_13, %c0_14], %26 {strides = array<i32>} : memref<32x128xf32, #tpu.memory_space<vmem>>, vector<32x128xf32>,
    } else {
    }
    %c3_i32 = arith.constant 3 : i32
    %10 = arith.cmpi eq, %arg1, %c3_i32 : i32
    %11 = arith.extui %10 : i1 to i32
    %c0_i32_3 = arith.constant 0 : i32
    %12 = arith.cmpi ne, %11, %c0_i32_3 : i32
    scf.if %12 {
      %c0 = arith.constant 0 : index
      %c0_4 = arith.constant 0 : index
      %13 = vector.load %arg11[%c0, %c0_4] : memref<32x128xf32, #tpu.memory_space<vmem>>, vector<32x128xf32>
      %cst = arith.constant 0.000000e+00 : f32
      %14 = vector.broadcast %cst : f32 to vector<32x128xf32>
      %15 = arith.maximumf %13, %14 : vector<32x128xf32>
      %c0_5 = arith.constant 0 : index
      %c0_6 = arith.constant 0 : index
      %16 = vector.load %arg11[%c0_5, %c0_6] : memref<32x128xf32, #tpu.memory_space<vmem>>, vector<32x128xf32>
      tpu.vector_store %arg11[%c0_5, %c0_6], %15 {strides = array<i32>} : memref<32x128xf32, #tpu.memory_space<vmem>>, vector<32x128xf32>,
    } else {
    }
    return
  }
  func.func @transform_0(%arg0: i32, %arg1: i32, %arg2: memref<8xi32, #tpu.memory_space<smem>>, %arg3: memref<8xi32, #tpu.memory_space<smem>>, %arg4: memref<8xi32, #tpu.memory_space<smem>>) -> (i32, i32) {
    %c0_i32 = arith.constant 0 : i32
    %c0_i32_0 = arith.constant 0 : i32
    return %arg0, %c0_i32 : i32, i32
  }
  func.func @transform_1(%arg0: i32, %arg1: i32, %arg2: memref<8xi32, #tpu.memory_space<smem>>, %arg3: memref<8xi32, #tpu.memory_space<smem>>, %arg4: memref<8xi32, #tpu.memory_space<smem>>) -> (i32, i32, i32) {
    %c4_i32 = arith.constant 4 : i32
    %0 = arith.muli %arg0, %c4_i32 : i32
    %1 = arith.addi %0, %arg1 : i32
    %2 = arith.index_cast %1 : i32 to index
    %3 = memref.load %arg3[%2] : memref<8xi32, #tpu.memory_space<smem>>
    %c4_i32_0 = arith.constant 4 : i32
    %4 = arith.muli %arg0, %c4_i32_0 : i32
    %5 = arith.addi %4, %arg1 : i32
    %6 = arith.index_cast %5 : i32 to index
    %7 = memref.load %arg4[%6] : memref<8xi32, #tpu.memory_space<smem>>
    %c0_i32 = arith.constant 0 : i32
    %c0_i32_1 = arith.constant 0 : i32
    return %3, %7, %c0_i32 : i32, i32, i32
  }
  func.func @transform_2(%arg0: i32, %arg1: i32, %arg2: memref<8xi32, #tpu.memory_space<smem>>, %arg3: memref<8xi32, #tpu.memory_space<smem>>, %arg4: memref<8xi32, #tpu.memory_space<smem>>) -> (i32, i32, i32) {
    %c0_i32 = arith.constant 0 : i32
    %c0_i32_0 = arith.constant 0 : i32
    %c0_i32_1 = arith.constant 0 : i32
    %c0_i32_2 = arith.constant 0 : i32
    return %c0_i32, %c0_i32_0, %c0_i32_1 : i32, i32, i32
  }
  func.func @transform_3(%arg0: i32, %arg1: i32, %arg2: memref<8xi32, #tpu.memory_space<smem>>, %arg3: memref<8xi32, #tpu.memory_space<smem>>, %arg4: memref<8xi32, #tpu.memory_space<smem>>) -> (i32, i32, i32) {
    %c0_i32 = arith.constant 0 : i32
    %c0_i32_0 = arith.constant 0 : i32
    return %arg1, %arg0, %c0_i32 : i32, i32, i32
  }
  func.func @transform_4(%arg0: i32, %arg1: i32, %arg2: memref<8xi32, #tpu.memory_space<smem>>, %arg3: memref<8xi32, #tpu.memory_space<smem>>, %arg4: memref<8xi32, #tpu.memory_space<smem>>) -> (i32, i32) {
    %c0_i32 = arith.constant 0 : i32
    %c0_i32_0 = arith.constant 0 : i32
    %c0_i32_1 = arith.constant 0 : i32
    return %c0_i32, %c0_i32_0 : i32, i32
  }
  func.func @transform_5(%arg0: i32, %arg1: i32, %arg2: memref<8xi32, #tpu.memory_space<smem>>, %arg3: memref<8xi32, #tpu.memory_space<smem>>, %arg4: memref<8xi32, #tpu.memory_space<smem>>) -> (i32, i32) {
    %c0_i32 = arith.constant 0 : i32
    %c0_i32_0 = arith.constant 0 : i32
    %c0_i32_1 = arith.constant 0 : i32
    return %c0_i32, %c0_i32_0 : i32, i32
  }
  func.func @transform_6(%arg0: i32, %arg1: i32, %arg2: memref<8xi32, #tpu.memory_space<smem>>, %arg3: memref<8xi32, #tpu.memory_space<smem>>, %arg4: memref<8xi32, #tpu.memory_space<smem>>) -> (i32, i32) {
    %c0_i32 = arith.constant 0 : i32
    %c0_i32_0 = arith.constant 0 : i32
    return %arg0, %c0_i32 : i32, i32
  }
}

</mosaic_0001>

<bundles_post_ra>
// kernel: tpu_custom_call.1
= control target key start
LH: loop header
LB: loop body
LE: loop exit
PB: predicated region body
PF: predicated region fallthrough
CT: control target
= control target key end

     0   :  { %s1357_s0 = inlined_call_operand.vmem [shape: s32[8], index: 0, kind: input, shape index: {}]   ;;  %s1358_s3 = inlined_call_operand.vmem [shape: bf16[64,64], index: 3, kind: input, shape index: {}]   ;;  %s1359_s4 = inlined_call_operand.vmem [shape: s8[4,64,64], index: 4, kind: input, shape index: {}]   ;;  %s1360_s5 = inlined_call_operand.vmem [shape: bf16[4,64,128], index: 5, kind: input, shape index: {}]   ;;  %s1361_s6 = inlined_call_operand.vmem [shape: f32[4,64,1], index: 6, kind: input, shape index: {}]   ;;  %s1362_s7 = inlined_call_operand.vmem [shape: bf16[64,128], index: 7, kind: input, shape index: {}]   ;;  %s1363_s8 = inlined_call_operand.vmem [shape: f32[1,128], index: 8, kind: input, shape index: {}]   ;;  %s1364_s9 = inlined_call_operand.hbm [shape: f32[64,128], index: 9, kind: output, shape index: {}]   ;;  %s1365_s1 = inlined_call_operand.vmem [shape: s32[8], index: 1, kind: input, shape index: {}]   ;;  %s1366_s2 = inlined_call_operand.vmem [shape: s32[8], index: 2, kind: input, shape index: {}]  }
   0x1   :  { %s14_s11 = sshll.u32 %s1357_s0, 4  ;;  %s18_s14 = sshll.u32 %s1365_s1, 4  ;;  %s15_s11 = int_to_ptr.vmem [resolvable:$true] %s14_s11  ;;  %s19_s14 = int_to_ptr.vmem [resolvable:$true] %s18_s14 }
   0x2   :  { %s946_s15 = scalar_lea.vmem %s15_s11, 16  ;;  %p951_p1 = scmp.lt.s32.totalorder %s15_s11, %s15_s11 }
   0x3   :  { %p947_p0 = scmp.ne.s32.totalorder %s15_s11, %s946_s15  ;;  %p952_p2 = scmp.lt.s32.totalorder %s946_s15, %s946_s15 }
   0x5   :  { %p953_p3 = por %p952_p2, %p951_p1 }
   0x7   :  { %p954_p4 = pnand %p953_p3, %p947_p0 }
   0x9   :  { %957 = shalt.err (!%p954_p4)  }
   0xa   :  { %s1080_s16 = smov [#allocation3]   ;;  %s958_s17 = scalar_lea.vmem %s19_s14, 16 }
   0xb   :  { %17 = dma.vmem_to_smem %s15_s11, 16, %s1080_s16, [#allocation2] }
   0xc   :  { %p959_p5 = scmp.ne.s32.totalorder %s19_s14, %s958_s17  ;;  %p963_p6 = scmp.lt.s32.totalorder %s19_s14, %s19_s14 }
   0xd   :  { %p964_p7 = scmp.lt.s32.totalorder %s958_s17, %s958_s17 }
   0xf   :  { %p965_p8 = por %p964_p7, %p963_p6 }
  0x11   :  { %p966_p9 = pnand %p965_p8, %p959_p5 }
  0x13   :  { %969 = shalt.err (!%p966_p9)  }
  0x14   :  { %s1081_s0 = smov [#allocation4]   ;;  %s22_s19 = sshll.u32 %s1366_s2, 4  ;;  %s23_s19 = int_to_ptr.vmem [resolvable:$true] %s22_s19 }
  0x15   :  { %21 = dma.vmem_to_smem %s19_s14, 16, %s1081_s0, [#allocation2] }
  0x16   :  { %s970_s20 = scalar_lea.vmem %s23_s19, 16  ;;  %p975_p11 = scmp.lt.s32.totalorder %s23_s19, %s23_s19 }
  0x17   :  { %p971_p10 = scmp.ne.s32.totalorder %s23_s19, %s970_s20  ;;  %p976_p12 = scmp.lt.s32.totalorder %s970_s20, %s970_s20 }
  0x19   :  { %p977_p13 = por %p976_p12, %p975_p11 }
  0x1b   :  { %p978_p0 = pnand %p977_p13, %p971_p10 }
  0x1d   :  { %981 = shalt.err (!%p978_p0)  }
  0x1e   :  { %s1082_s21 = smov [#allocation5]  }
  0x1f   :  { %25 = dma.vmem_to_smem %s23_s19, 16, %s1082_s21, [#allocation2] }
  0x20   :  { %1042 = dma.done.wait [#allocation2], 48 }
  0x21   :  { %1043 = vsyncadd [#allocation2], 4294967248 }
  0x22   :  { %27 = sfence }
  0x23   :  { %28 = vsyncpa [#allocation7], 0 }
  0x24   :  { %30 = vsyncpa [#allocation7 + $0x1], 0  ;;  %s1146_s22 = smov 0   ;;  %s1148_s23 = smov 0  }
  0x25   :  { %s1150_s2 = smov 0   ;;  %s1152_s24 = smov 0  }
  0x26   :  { %s1154_s25 = smov 0   ;;  %s1156_s26 = smov 0  }
  0x27   :  { %s1158_s27 = smov 0   ;;  %s1160_s28 = smov 0  }
  0x28 LB: > { %1376 = sst [smem:[#allocation10_spill]] %s1050_s22  ;;  %s777_s29 = sadd.s32 4294967295, %s1078_s28   ;;  %s1078_s28 = sphi %s1160_s28, %s36_s28   ;;  %s1074_s27 = sphi %s1158_s27, %s1396_s27   ;;  %s1070_s26 = sphi %s1156_s26, %s1395_s26   ;;  %s1066_s25 = sphi %s1154_s25, %s1394_s25   ;;  %s1062_s24 = sphi %s1152_s24, %s1393_s24   ;;  %s1058_s2 = sphi %s1150_s2, %s1392_s2   ;;  %s1054_s23 = sphi %s1148_s23, %s1398_s23   ;;  %s1050_s22 = sphi %s1146_s22, %s1397_s22  }
  0x29   : > { %1377 = sst [smem:[#allocation11_spill]] %s1058_s2  ;;  %s778_s30 = sadd.s32 4294967294, %s1078_s28  }
  0x2a   : > { %1378 = sst [smem:[#allocation12_spill]] %s1070_s26  ;;  %s45_s10 = sadd.s32 1, %s1070_s26 }
  0x2b   : > { %1379 = sst [smem:[#allocation13_spill]] %s1074_s27  ;;  %p46_p1 = scmp.ge.s32.totalorder %s45_s10, 4 }
  0x2c   : > { %1380 = sst [smem:[#allocation14_spill]] %s1078_s28  ;;  %s48_s11 = sadd.s32 1, %s1074_s27 }
  0x2d   : > { %p218_p2 = scmp.ne.s32.totalorder %s1058_s2, %s1054_s23  ;;  %p219_p3 = scmp.eq.s32.totalorder %s777_s29, 7 }
  0x2e   : > { %s1400_s10 = smov (%p46_p1, %s45_s10), 0  ;;  %s1402_s11 = smov (!%p46_p1, %s48_s11), %s1074_s27 }
  0x2f   : > { %1381 = sst [smem:[#allocation15_spill]] %s1400_s10  ;;  %p1195_p4 = por %p219_p3, %p218_p2 }
  0x30   : > { %p224_p5 = scmp.ne.s32.totalorder %s1054_s23, %s1050_s22  ;;  %p50_p6 = scmp.ge.s32.totalorder %s1402_s11, 2 }
  0x31   : > { %p225_p7 = scmp.eq.s32.totalorder %s778_s30, 7  ;;  %p783_p8 = scmp.ge.s32.totalorder %s1078_s28, 1 }
  0x32   : > { %p293_p9 = scmp.lt.s32.totalorder %s1078_s28, 9  ;;  %s1404_s11 = smov (%p50_p6, %s1402_s11), 0 }
  0x33   : > { %1383 = sst [smem:[#allocation16_spill]] %s1404_s11  ;;  %p1205_p10 = por %p225_p7, %p224_p5 }
  0x34   : > { %p294_p11 = pnand %p783_p8, %p293_p9  ;;  %s205_s14 = ssub.s32 %s1074_s27, %s1404_s11 }
  0x35   : > { %s1384_s13 = scalar_select %p1205_p10, 1, 0 }
  0x36   : > { %s208_s15 = sadd.s32 1, %s1058_s2  ;;  %p206_p12 = scmp.eq.s32.totalorder %s205_s14, 0 }
  0x37   : > { %1385 = sst [smem:[#allocation17_spill]] %s1384_s13  ;;  %297 = sbr.rel (%p294_p11) target bundleno = 581 (0x245), region = 44 }
  0x38   : > { %s1213_s16 = scalar_select %p206_p12, %s1058_s2, %s208_s15  }
  0x39   : > { %s1368_s17 = sand.u32 (!%p294_p11), 1, %s1054_s23   ;;  %s785_s0 = sshll.u32 (!%p294_p11), %s1066_s25, 2 }
  0x3a   : > { %1386 = sst [smem:[#allocation18_spill]] %s1213_s16  ;;  %s784_s1 = sshll.u32 (!%p294_p11), %s1368_s17, 5 }
  0x3b   : > { %p345_p13 = scmp.lt.s32.totalorder (!%p294_p11), %s785_s0, 7  ;;  %s1220_s18 = sadd.s32 (!%p294_p11), %s1062_s24, %s785_s0 }
  0x3c   : > { %s352_s19 = sld [smem:[#allocation4 + %s1220_s18]] (!%p294_p11)  ;;  %p367_p0 = scmp.lt.s32.totalorder (!%p294_p11), %s1062_s24, 3 }
  0x3d   : > { %s353_s20 = sld [smem:[#allocation5 + %s1220_s18]] (!%p294_p11)  ;;  %s1241_s30 = scalar_lea.vmem (!%p294_p11), [#allocation6], %s784_s1 }
  0x3e   : > { %s1406_s0 = smov (!%p345_p13, %s785_s0), 7  ;;  %p794_p3 = scmp.ne.s32.totalorder %s1062_s24, 0 }
  0x3f   : > { %s786_s21 = sshll.u32 %s1406_s0, 2  ;;  %v934_v0 = vld [vmem:[%s1362_s7] sm:$0xff] (!%p794_p3)   ;;  %v935_v1 = vld [vmem:[%s1362_s7 + $0x8] sm:$0xff] (!%p794_p3)   ;;  %v936_v2 = vld [vmem:[%s1362_s7 + $0x10] sm:$0xff] (!%p794_p3)   ;;  %vm437_vm0 = vcmask (!%p794_p3), 523264  }
  0x40   : > { %s1228_s14 = scalar_lea.vmem %s1358_s3, %s786_s21  ;;  %833 = vmatprep.subr.bf16.mxu0 (!%p794_p3), %v934_v0  ;;  %v937_v4 = vld [vmem:[%s1362_s7 + $0x18] sm:$0xff] (!%p794_p3)   ;;  %v795_v6 = vld [vmem:[%s1363_s8] ss:$0 sm:$0xff] (!%p794_p3) }
  0x41   : > { %s368_s15 = scalar_select %p367_p0, %s1062_s24, 3 }
  0x42   : > { %p354_p1 = scmp.lt.s32.totalorder %s352_s19, 3  ;;  %383 = sbr.rel (%p794_p3) target bundleno = 299 (0x12b), region = 48  ;;  %834 = vmatpush3.bf16.msra.mxu0 (!%p794_p3), %v934_v0  ;;  %v938_v3 = vld [vmem:[%s1228_s14] sm:$0xff] (!%p794_p3)   ;;  %v939_v5 = vld [vmem:[%s1228_s14 + $0x8] sm:$0xff] (!%p794_p3)  }
  0x43   : > { %s791_s11 = sshll.u32 %s368_s15, 3  ;;  %p356_p2 = scmp.lt.s32.totalorder %s353_s20, 1  ;;  %835 = vmatprep.subr.bf16.mxu0 (!%p794_p3), %v935_v1  ;;  %841 = vmatprep.mubr.msk.bf16.mxu0 (!%p794_p3), %vm437_vm0, %v938_v3 }
  0x44   : > { %s372_s17 = sadd.s32 %s791_s11, %s1406_s0  ;;  %s1408_s19 = smov (!%p354_p1, %s352_s19), 3 }
  0x45   : > { %s1410_s20 = smov (!%p356_p2, %s353_s20), 1  ;;  %s788_s10 = sshll.u32 %s1408_s19, 1 }
  0x46   : > { %s792_s27 = sshll.u32 %s372_s17, 3  ;;  %s359_s26 = sadd.s32 %s788_s10, %s1410_s20  ;;  %836 = vmatpush3.bf16.msra.mxu0 (!%p794_p3), %v935_v1 }
  0x47   : > { %s1234_s13 = scalar_lea.vmem %s1361_s6, %s792_s27  ;;  %s789_s22 = sshll.u32 %s359_s26, 3  ;;  %837 = vmatprep.subr.bf16.mxu0 (!%p794_p3), %v936_v2 }
  0x48   : > { %s1239_s21 = scalar_lea.vmem %s1359_s4, %s789_s22 }
  0x4a   : > { %838 = vmatpush3.bf16.msra.mxu0 %v936_v2 }
  0x4b   : > { %839 = vmatprep.subr.bf16.mxu0 %v937_v4 }
  0x4e   : > { %840 = vmatpush3.bf16.msra.mxu0 %v937_v4 }
  0x51   : > { %842 = vmatmul.mubr.msk.bf16.vlgmr.msra.gmra.mrb[0].mxu0 %vm437_vm0, %v939_v5 }
 0x124   : > { %v843_v7 = vpop.f32.mrb[0].mxu0 }
 0x125   : > { %v487_v8 = vadd.f32 %v843_v7, %v795_v6  ;;  %v478_v9 = vpop.f32.mrb[1].mxu0 }
 0x126   : > { %v479_v10 = vadd.f32 %v795_v6, %v478_v9  ;;  %v844_v11 = vpop.f32.mrb[2].mxu0 }
 0x127   : > { %495 = vst [vmem:[%s1241_s30 + $0x10] sm:$0xff] %v487_v8  ;;  %v490_v12 = vadd.f32 %v844_v11, %v795_v6  ;;  %v481_v13 = vpop.f32.mrb[3].mxu0 }
 0x128   : > { %493 = vst [vmem:[%s1241_s30] sm:$0xff] %v479_v10  ;;  %v482_v14 = vadd.f32 %v795_v6, %v481_v13 }
 0x129   : > { %496 = vst [vmem:[%s1241_s30 + $0x18] sm:$0xff] %v490_v12 }
 0x12a   : > { %494 = vst [vmem:[%s1241_s30 + $0x8] sm:$0xff] %v482_v14 }
 0x12b PF: > { %s497_s1 = sld [smem:[#allocation3 + %s1220_s18]] }
 0x131   : > { %p804_p5 = scmp.eq.s32.totalorder %s497_s1, 0 }
 0x132   : > { %s819_s19 = sshll.u32 (!%p804_p5), %s1062_s24, 5  ;;  %v502_v15 = vld [vmem:[%s1239_s21] sm:$0xff] (!%p804_p5)  ;;  %vm540_vm1 = vcmask (!%p804_p5), 523264   ;;  %v602_v16 = vld [vmem:[%s1234_s13 + $0x10] sm:$0xff] (!%p804_p5)  ;;  %v1083_v19 = vmov (!%p804_p5), 0   ;;  %v603_v20 = vld [vmem:[%s1234_s13 + $0x18] sm:$0xff] (!%p804_p5) }
 0x133   : > { %501 = sbr.rel (%p804_p5) target bundleno = 545 (0x221), region = 52  ;;  %v600_v17 = vld [vmem:[%s1234_s13] sm:$0xff] (!%p804_p5)  ;;  %s507_s15 = scalar_lea.vmem (!%p804_p5), %s1360_s5, %s819_s19  ;;  %v503_v18 = vunpack.c.l.s8.bf16 (!%p804_p5), %v502_v15  ;;  %941 = vset.pattern.permute.xlu1 (!%p804_p5), %v1083_v19  ;;  %940 = vset.pattern.permute.xlu0 (!%p804_p5), %v1083_v19  ;;  %v601_v23 = vld [vmem:[%s1234_s13 + $0x8] sm:$0xff] (!%p804_p5)  ;;  %v504_v26 = vunpack.c.h.s8.bf16 (!%p804_p5), %v502_v15  ;;  %v598_v30 = vld [vmem:[%s1241_s30 + $0x10] sm:$0xff] (!%p804_p5) }
 0x134   : > { %v942_v21 = vld [vmem:[%s507_s15] sm:$0xff] (!%p804_p5)   ;;  %616 = vperm.xlu1 (!%p804_p5), %941, %v602_v16   ;;  %606 = vperm.xlu0 (!%p804_p5), %940, %v600_v17   ;;  %v943_v22 = vld [vmem:[%s507_s15 + $0x8] sm:$0xff] (!%p804_p5)   ;;  %v944_v24 = vld [vmem:[%s507_s15 + $0x10] sm:$0xff] (!%p804_p5)  }
 0x135   : > { %853 = vmatprep.mubr.msk.bf16.mxu0 (!%p804_p5), %vm540_vm1, %v503_v18  ;;  %845 = vmatprep.subr.bf16.mxu0 (!%p804_p5), %v942_v21  ;;  %v945_v25 = vld [vmem:[%s507_s15 + $0x18] sm:$0xff] (!%p804_p5)   ;;  %v596_v33 = vld [vmem:[%s1241_s30] sm:$0xff] (!%p804_p5)  ;;  %v597_v42 = vld [vmem:[%s1241_s30 + $0x8] sm:$0xff] (!%p804_p5) }
 0x136   : > { %846 = vmatpush3.bf16.msra.mxu0 (!%p804_p5), %v942_v21  ;;  %v599_v37 = vld [vmem:[%s1241_s30 + $0x18] sm:$0xff] (!%p804_p5) }
 0x137   : > { %847 = vmatprep.subr.bf16.mxu0 (!%p804_p5), %v943_v22 }
 0x138   : > { %621 = vperm.xlu1 (!%p804_p5), %941, %v603_v20   ;;  %611 = vperm.xlu0 (!%p804_p5), %940, %v601_v23  }
 0x13a   : > { %848 = vmatpush3.bf16.msra.mxu0 %v943_v22 }
 0x13b   : > { %849 = vmatprep.subr.bf16.mxu0 %v944_v24 }
 0x13e   : > { %850 = vmatpush3.bf16.msra.mxu0 %v944_v24 }
 0x13f   : > { %851 = vmatprep.subr.bf16.mxu0 %v945_v25 }
 0x142   : > { %852 = vmatpush3.bf16.msra.mxu0 %v945_v25 }
 0x145   : > { %854 = vmatmul.mubr.msk.bf16.vlgmr.msra.gmra.mrb[0].mxu0 %vm540_vm1, %v504_v26 }
 0x1b3   : > { %v617_v27 = vpop.permute.xlu1 %616  ;;  %v607_v28 = vpop.permute.xlu0 %606 }
 0x1b7   : > { %v622_v34 = vpop.permute.xlu1 %621  ;;  %v612_v38 = vpop.permute.xlu0 %611 }
 0x218   : > { %v855_v29 = vpop.f32.mrb[0].mxu0 }
 0x219   : > { %v626_v31 = vmul.f32 %v855_v29, %v617_v27  ;;  %v581_v32 = vpop.f32.mrb[1].mxu0 }
 0x21a   : > { %v624_v35 = vmul.f32 %v607_v28, %v581_v32  ;;  %v856_v36 = vpop.f32.mrb[2].mxu0 }
 0x21b   : > { %v630_v39 = vadd.f32 %v626_v31, %v598_v30  ;;  %v627_v40 = vmul.f32 %v856_v36, %v622_v34  ;;  %v584_v41 = vpop.f32.mrb[3].mxu0 }
 0x21c   : > { %v628_v43 = vadd.f32 %v624_v35, %v596_v33  ;;  %v625_v44 = vmul.f32 %v612_v38, %v584_v41 }
 0x21d   : > { %634 = vst [vmem:[%s1241_s30 + $0x10] sm:$0xff] %v630_v39  ;;  %v631_v45 = vadd.f32 %v627_v40, %v599_v37 }
 0x21e   : > { %632 = vst [vmem:[%s1241_s30] sm:$0xff] %v628_v43  ;;  %v629_v46 = vadd.f32 %v625_v44, %v597_v42 }
 0x21f   : > { %635 = vst [vmem:[%s1241_s30 + $0x18] sm:$0xff] %v631_v45 }
 0x220   : > { %633 = vst [vmem:[%s1241_s30 + $0x8] sm:$0xff] %v629_v46 }
 0x221 PF: > { %p813_p6 = scmp.ne.s32.totalorder %s1062_s24, 3 }
 0x223   : > { %639 = sbr.rel (%p813_p6) target bundleno = 555 (0x22b), region = 56 }
 0x224   : > { %v642_v49 = vld [vmem:[%s1241_s30 + $0x10] sm:$0xff] (!%p813_p6) }
 0x225   : > { %v640_v47 = vld [vmem:[%s1241_s30] sm:$0xff] (!%p813_p6)  ;;  %v646_v52 = vmax.f32 (!%p813_p6), %v642_v49, 0.0 }
 0x226   : > { %v644_v50 = vmax.f32 (!%p813_p6), %v640_v47, 0.0  ;;  %v643_v53 = vld [vmem:[%s1241_s30 + $0x18] sm:$0xff] (!%p813_p6) }
 0x227   : > { %v641_v48 = vld [vmem:[%s1241_s30 + $0x8] sm:$0xff] (!%p813_p6)  ;;  %v647_v54 = vmax.f32 (!%p813_p6), %v643_v53, 0.0  ;;  %650 = vst [vmem:[%s1241_s30 + $0x10] sm:$0xff] (!%p813_p6), %v646_v52 }
 0x228   : > { %v645_v51 = vmax.f32 (!%p813_p6), %v641_v48, 0.0  ;;  %648 = vst [vmem:[%s1241_s30] sm:$0xff] (!%p813_p6), %v644_v50 }
 0x229   : > { %651 = vst [vmem:[%s1241_s30 + $0x18] sm:$0xff] (!%p813_p6), %v647_v54 }
 0x22a   : > { %649 = vst [vmem:[%s1241_s30 + $0x8] sm:$0xff] %v645_v51 }
 0x22b PF: > { %s820_s24 = sshll.u32 %s1066_s25, 9  ;;  %s666_s21 = sshll.u32 %s1241_s30, 4  ;;  %s1301_s21 = int_to_ptr.vmem [resolvable:$true] %s666_s21 }
 0x22c   : > { %s1298_s29 = scalar_lea.hbm %s1364_s9, %s820_s24  ;;  %s1387_s11 = sand.u32 1, %s1054_s23  }
 0x22d   : > { %s1305_s0 = scalar_lea.sflag [#allocation7], %s1387_s11  ;;  %s982_s2 = scalar_lea.vmem %s1301_s21, 512 }
 0x22e   : > { %p983_p7 = scmp.ne.s32.totalorder %s1301_s21, %s982_s2  ;;  %s1084_s25 = smov [#allocation6]  }
 0x22f   : > { %s986_s27 = sshll.u32 %s1084_s25, 4  ;;  %s987_s27 = int_to_ptr.vmem [resolvable:$false] %s986_s27 }
 0x230   : > { %p984_p8 = pnand %p983_p7, %p1195_p4  ;;  %s988_s26 = scalar_lea.vmem %s987_s27, 1024 }
 0x231   : > { %p989_p11 = scmp.lt.s32.totalorder %s1301_s21, %s987_s27  ;;  %p990_p12 = scmp.lt.s32.totalorder %s988_s26, %s982_s2 }
 0x232   : > { %p985_p9 = pneg %p984_p8 }
 0x233   : > { %p991_p13 = por %p990_p12, %p989_p11 }
 0x235   : > { %p992_p0 = pnand %p991_p13, %p985_p9 }
 0x237   : > { %995 = shalt.err (!%p992_p0)
}
 0x238   : > { %s996_s30 = scalar_lea.hbm %s1298_s29, 512  ;;  %s1000_s10 = scalar_lea.hbm %s1364_s9, 1024 }
 0x239   : > { %p997_p1 = scmp.ne.s32.totalorder %s1298_s29, %s996_s30  ;;  %p1001_p5 = scmp.lt.u32.totalorder %s1298_s29, %s1364_s9 }
 0x23a   : > { %p1002_p6 = scmp.lt.u32.totalorder %s1000_s10, %s996_s30  ;;  %p1004_p8 = scmp.lt.u32.totalorder %s996_s30, %s1298_s29 }
 0x23b   : > { %p998_p2 = pnand %p997_p1, %p1195_p4 }
 0x23c   : > { %p1003_p7 = por %p1002_p6, %p1001_p5 }
 0x23d   : > { %p999_p3 = pneg %p998_p2 }
 0x23e   : > { %p1005_p9 = por %p1004_p8, %p1003_p7 }
 0x240   : > { %p1006_p11 = pnand %p1005_p9, %p999_p3 }
 0x242   : > { %1009 = shalt.err (!%p1006_p11)
}
 0x243   : > { %s1085_s1 = smov 128   ;;  %s1086_s19 = smov 8  }
 0x244   : > { %857 = dma.vmem_to_hbm [thread:$0]  (%p1195_p4), %s1301_s21, 512, %s1298_s29, %s1305_s0, %s1085_s1, %s1085_s1, %s1086_s19  }
 0x245 PF: > { %s1388_s20 = sld [smem:[#allocation14_spill]]  ;;  %s1389_s14 = sld [smem:[#allocation10_spill]] }
 0x24b   : > { %p863_p12 = scmp.ge.s32.totalorder %s1388_s20, 2  ;;  %s681_s24 = sand.u32 1, %s1389_s14  }
 0x24c   : > { %s682_s13 = scalar_lea.sflag [#allocation7], %s681_s24 }
 0x24d   : > { %p860_p13 = pnand %p863_p12, %p1205_p10 }
 0x24f   : > { %1045 = dma.done.wait (!%p860_p13), %s682_s13, 512  }
 0x250   : > { %1047 = vsyncadd (!%p860_p13), %s682_s13, 4294966784  ;;  %s36_s28 = sadd.s32 1, %s1388_s20   ;;  %s1391_s18 = sld [smem:[#allocation11_spill]] }
 0x251   : > { %p33_p0 = scmp.ge.s32.totalorder %s36_s28, 10   ;;  %s1392_s2 = sld [smem:[#allocation18_spill]] }
 0x252   : > { %s1393_s24 = sld [smem:[#allocation12_spill]]  ;;  %s1394_s25 = sld [smem:[#allocation13_spill]] }
 0x253   : > { %s1395_s26 = sld [smem:[#allocation15_spill]]  ;;  %s1396_s27 = sld [smem:[#allocation16_spill]] }
 0x254   : > { %s1397_s22 = smov %s1054_s23  ;;  %35 = sbr.rel (!%p33_p0) target bundleno = 40 (0x28), region = 98 }
 0x256   : > { %s1398_s23 = smov %s1391_s18 }
 0x25b   :  { %687 = vsyncpa [#allocation7], 1 }
 0x25c   :  { %689 = vsyncpa [#allocation7 + $0x1], 1 }

</bundles_post_ra>
